<compile_context>
chip_gen: v7x
topology: tpu7x:2x2x1
jax: 0.10.0
libtpu: 0.0.40
codegen_flags: <defaults>
</compile_context>

<pallas_src>
import functools

import jax
import jax.numpy as jnp
from jax.experimental import pallas as pl
from jax.experimental.pallas import tpu as pltpu

NEG_SLOPE = 0.2
EPS = 1e-5
REF_PREC = jax.lax.Precision.HIGHEST     # reference only
MXU_PREC = jax.lax.Precision.DEFAULT     # kernels: explicit single bf16 pass
Y1_DTYPE = jnp.bfloat16                  # inter-kernel intermediate dtype


# ----------------------------------------------------------------------------
# Shared helper: 3x3 / pad=1 conv on lane-dense activations via rolled taps.
# ----------------------------------------------------------------------------
def _conv3x3_lane_dense(a, w9_ref, H, W):
    """a: (C, H*W) f32 activation (already BN+LeakyReLU'd).
    w9_ref: (9, Cout, C) VMEM ref; tap t = ky*3 + kx, (dy, dx) = (ky-1, kx-1).
    Returns (Cout, H*W) f32 accumulator (no bias).

    tap_{dy,dx}[c, p] = a[c, p + dy*W + dx] where valid, else 0 (zero pad).
    The cyclic wrap of the lane roll lands exactly on the masked-out lanes.
    """
    C, HW = a.shape
    lane = jax.lax.broadcasted_iota(jnp.int32, (C, HW), 1)
    if (W & (W - 1)) == 0:                       # power-of-2 W: avoid vector rem
        colj = jnp.bitwise_and(lane, W - 1)
    else:
        colj = lane % W
    dx_ok = {-1: colj >= 1, 0: None, 1: colj <= W - 2}
    dy_ok = {-1: lane >= W, 0: None, 1: lane < (H - 1) * W}

    acc = None
    t = 0
    for dy in (-1, 0, 1):
        for dx in (-1, 0, 1):
            s = dy * W + dx
            tap = a if s == 0 else pltpu.roll(a, shift=(-s) % HW, axis=1)
            m = dy_ok[dy]
            if dx_ok[dx] is not None:
                m = dx_ok[dx] if m is None else jnp.logical_and(m, dx_ok[dx])
            if m is not None:
                tap = jnp.where(m, tap, 0.0)
            d = jnp.dot(w9_ref[t], tap, preferred_element_type=jnp.float32,
                        precision=MXU_PREC)
            acc = d if acc is None else acc + d
            t += 1
    return acc


# ----------------------------------------------------------------------------
# Kernel 1: fused BN(batch-stats, pre-folded) + LeakyReLU + conv3x3(pad=1)
#           also emits per-image sum / sum(y^2) of y1 for the BN2 fold.
# ----------------------------------------------------------------------------
def _bnrelu_conv3_kernel(x_ref, scale_ref, shift_ref, w_ref, b_ref,
                         y_ref, mom_ref, *, H, W):
    # x_ref:   (1, Cin, H*W) f32       scale/shift: (Cin, 1)
    # w_ref:   (9, Cout, Cin)          b_ref:       (Cout, 1)
    # y_ref:   (1, Cout, H*W) bf16     mom_ref:     (1, Cout, 2) f32
    x = x_ref[0]                                    # (Cin, HW), lane-dense
    a = x * scale_ref[...] + shift_ref[...]         # folded batchnorm
    a = jnp.maximum(a, NEG_SLOPE * a)               # LeakyReLU(0.2)

    acc = _conv3x3_lane_dense(a, w_ref, H, W) + b_ref[...]

    y_bf = acc.astype(y_ref.dtype)
    y_ref[0] = y_bf

    # BN2 moments from the *rounded* y1 (exactly what kernel 2 normalises).
    # NOTE: if a bundle dump shows the XLU slot binding (rolls + these cross-
    # lane sums), swap these for (y @ ones(HW,1)) MXU dots instead.
    y_r = y_bf.astype(jnp.float32)
    mom_ref[0, :, 0:1] = jnp.sum(y_r, axis=1, keepdims=True)
    mom_ref[0, :, 1:2] = jnp.sum(y_r * y_r, axis=1, keepdims=True)


def bnrelu_conv3(x_flat, scale, shift, w_taps, b, H, W):
    N, Cin, HW = x_flat.shape
    Cout = w_taps.shape[1]
    kernel = functools.partial(_bnrelu_conv3_kernel, H=H, W=W)
    return pl.pallas_call(
        kernel,
        out_shape=(jax.ShapeDtypeStruct((N, Cout, HW), Y1_DTYPE),
                   jax.ShapeDtypeStruct((N, Cout, 2), jnp.float32)),
        grid=(N,),
        in_specs=[
            pl.BlockSpec((1, Cin, HW), lambda n: (n, 0, 0)),
            pl.BlockSpec((Cin, 1), lambda n: (0, 0)),
            pl.BlockSpec((Cin, 1), lambda n: (0, 0)),
            pl.BlockSpec((9, Cout, Cin), lambda n: (0, 0, 0)),
            pl.BlockSpec((Cout, 1), lambda n: (0, 0)),
        ],
        out_specs=(
            pl.BlockSpec((1, Cout, HW), lambda n: (n, 0, 0)),
            pl.BlockSpec((1, Cout, 2), lambda n: (n, 0, 0)),
        ),
        compiler_params=pltpu.CompilerParams(dimension_semantics=("parallel",)),
    )(x_flat, scale.reshape(Cin, 1), shift.reshape(Cin, 1), w_taps,
      b.reshape(Cout, 1))


# ----------------------------------------------------------------------------
# Kernel 2: fused BN + LeakyReLU + conv3x3(pad=1) + 1x1-skip conv + add
# ----------------------------------------------------------------------------
def _bnrelu_conv3_skip_kernel(y_ref, x_ref, scale_ref, shift_ref, w2_ref,
                              b2_ref, ws_ref, bs_ref, o_ref, *, H, W):
    # y_ref:  (1, Cmid, H*W) bf16 (conv1 output)   x_ref: (1, Cin, H*W) raw f32
    # w2_ref: (9, Cout, Cmid)   ws_ref: (Cout, Cin)   b2/bs: (Cout, 1)
    # o_ref:  (1, Cout, H*W) f32
    y = y_ref[0].astype(jnp.float32)                # (Cmid, HW), lane-dense
    a = y * scale_ref[...] + shift_ref[...]
    a = jnp.maximum(a, NEG_SLOPE * a)

    acc = _conv3x3_lane_dense(a, w2_ref, H, W) + b2_ref[...]

    # skip path: 1x1 conv on the raw (lane-dense) input
    skip = jnp.dot(ws_ref[...], x_ref[0], preferred_element_type=jnp.float32,
                   precision=MXU_PREC) + bs_ref[...]

    # TODO(synk): emit bf16 here if the consumer of the unit tolerates it
    #             (halves the largest per-step HBM store on v5e/v6e).
    o_ref[0] = (acc + skip).astype(o_ref.dtype)


def bnrelu_conv3_skip(y1, x_flat, scale, shift, w2_taps, b2, ws, bs, H, W):
    N, Cmid, HW = y1.shape
    Cin = x_flat.shape[1]
    Cout = w2_taps.shape[1]
    kernel = functools.partial(_bnrelu_conv3_skip_kernel, H=H, W=W)
    return pl.pallas_call(
        kernel,
        out_shape=jax.ShapeDtypeStruct((N, Cout, HW), jnp.float32),
        grid=(N,),
        in_specs=[
            pl.BlockSpec((1, Cmid, HW), lambda n: (n, 0, 0)),
            pl.BlockSpec((1, Cin, HW), lambda n: (n, 0, 0)),
            pl.BlockSpec((Cmid, 1), lambda n: (0, 0)),
            pl.BlockSpec((Cmid, 1), lambda n: (0, 0)),
            pl.BlockSpec((9, Cout, Cmid), lambda n: (0, 0, 0)),
            pl.BlockSpec((Cout, 1), lambda n: (0, 0)),
            pl.BlockSpec((Cout, Cin), lambda n: (0, 0)),
            pl.BlockSpec((Cout, 1), lambda n: (0, 0)),
        ],
        out_specs=pl.BlockSpec((1, Cout, HW), lambda n: (n, 0, 0)),
        compiler_params=pltpu.CompilerParams(dimension_semantics=("parallel",)),
    )(y1, x_flat, scale.reshape(Cmid, 1), shift.reshape(Cmid, 1),
      w2_taps, b2.reshape(Cout, 1), ws, bs.reshape(Cout, 1))


# ----------------------------------------------------------------------------
# Glue: batch-stat folding + module forward (NCHW in / NCHW out)
# ----------------------------------------------------------------------------
def residual_unit1_forward(x_nchw, p):
    N, Cin, H, W = x_nchw.shape
    x_flat = x_nchw.reshape(N, Cin, H * W)          # lane-dense, free in HBM

    # BN1 fold from batch statistics of the raw input (training-mode BN)
    mean1 = jnp.mean(x_nchw, axis=(0, 2, 3))
    var1 = jnp.mean((x_nchw - mean1.reshape(1, -1, 1, 1)) ** 2, axis=(0, 2, 3))
    s1 = p["bn1_gamma"] / jnp.sqrt(var1 + EPS)
    t1 = p["bn1_beta"] - mean1 * s1

    y1, mom = bnrelu_conv3(x_flat, s1, t1, p["w1_taps"], p["b1"], H, W)

    # BN2 fold from the in-kernel moments (no extra HBM pass over y1)
    count = float(N * H * W)
    sum1 = jnp.sum(mom[:, :, 0], axis=0)
    sumsq = jnp.sum(mom[:, :, 1], axis=0)
    mean2 = sum1 / count
    var2 = jnp.maximum(sumsq / count - mean2 * mean2, 0.0)   # biased, clamped
    s2 = p["bn2_gamma"] / jnp.sqrt(var2 + EPS)
    t2 = p["bn2_beta"] - mean2 * s2

    out = bnrelu_conv3_skip(y1, x_flat, s2, t2, p["w2_taps"], p["b2"],
                            p["ws_mat"], p["bs"], H, W)
    return out.reshape(N, -1, H, W)                 # (N,Cout,H*W) is already NCHW


# ----------------------------------------------------------------------------
# Pure-JAX reference (mirrors the PyTorch forward) for verification
# ----------------------------------------------------------------------------
def _ref_forward(x_nchw, p):
    def bn_lrelu(x, gamma, beta):
        mean = jnp.mean(x, axis=(0, 2, 3), keepdims=True)
        var = jnp.mean((x - mean) ** 2, axis=(0, 2, 3), keepdims=True)
        xn = (x - mean) / jnp.sqrt(var + EPS)
        xn = xn * gamma.reshape(1, -1, 1, 1) + beta.reshape(1, -1, 1, 1)
        return jnp.where(xn >= 0, xn, NEG_SLOPE * xn)

    def conv(x, w_oihw, b, pad):
        y = jax.lax.conv_general_dilated(
            x, w_oihw, (1, 1), [(pad, pad), (pad, pad)],
            dimension_numbers=("NCHW", "OIHW", "NCHW"), precision=REF_PREC)
        return y + b.reshape(1, -1, 1, 1)

    a = bn_lrelu(x_nchw, p["bn1_gamma"], p["bn1_beta"])
    y1 = conv(a, p["w1_oihw"], p["b1"], 1)
    a2 = bn_lrelu(y1, p["bn2_gamma"], p["bn2_beta"])
    y2 = conv(a2, p["w2_oihw"], p["b2"], 1)
    s = conv(x_nchw, p["ws_oihw"], p["bs"], 0)
    return y2 + s


if __name__ == "__main__":
    N, IN_C, OUT_C, H, W = 2, 4, 8, 16, 16

    key = jax.random.PRNGKey(0)
    ks = jax.random.split(key, 9)

    w1_oihw = 0.1 * jax.random.normal(ks[0], (OUT_C, IN_C, 3, 3), jnp.float32)
    b1 = 0.1 * jax.random.normal(ks[1], (OUT_C,), jnp.float32)
    w2_oihw = 0.1 * jax.random.normal(ks[2], (OUT_C, OUT_C, 3, 3), jnp.float32)
    b2 = 0.1 * jax.random.normal(ks[3], (OUT_C,), jnp.float32)
    ws_oihw = 0.1 * jax.random.normal(ks[4], (OUT_C, IN_C, 1, 1), jnp.float32)
    bs = 0.1 * jax.random.normal(ks[5], (OUT_C,), jnp.float32)
    bn1_gamma = 1.0 + 0.1 * jax.random.normal(ks[6], (IN_C,), jnp.float32)
    bn1_beta = 0.1 * jax.random.normal(ks[7], (IN_C,), jnp.float32)
    bn2_gamma = jnp.ones((OUT_C,), jnp.float32)
    bn2_beta = jnp.zeros((OUT_C,), jnp.float32)

    params = dict(
        w1_oihw=w1_oihw, b1=b1, w2_oihw=w2_oihw, b2=b2,
        ws_oihw=ws_oihw, bs=bs,
        bn1_gamma=bn1_gamma, bn1_beta=bn1_beta,
        bn2_gamma=bn2_gamma, bn2_beta=bn2_beta,
        # kernel-layout weights: OIHW -> (9, Cout, Cin) with tap t = ky*3 + kx
        w1_taps=jnp.transpose(w1_oihw, (2, 3, 0, 1)).reshape(9, OUT_C, IN_C),
        w2_taps=jnp.transpose(w2_oihw, (2, 3, 0, 1)).reshape(9, OUT_C, OUT_C),
        ws_mat=ws_oihw[:, :, 0, 0],                       # (Cout, Cin)
    )

    x = jax.random.normal(ks[8], (N, IN_C, H, W), jnp.float32)

    out = jax.block_until_ready(residual_unit1_forward(x, params))
    ref = jax.block_until_ready(_ref_forward(x, params))

    assert out.shape == (N, OUT_C, H, W)
    # Kernels use an explicit single-pass bf16 MXU and a bf16 y1 intermediate;
    # the reference is f32 / HIGHEST, so compare with a bf16-appropriate bound.
    rel = float(jnp.linalg.norm(out - ref) / jnp.linalg.norm(ref))
    max_abs = float(jnp.max(jnp.abs(out - ref)))
    assert rel < 3e-2 and max_abs < 1.5e-1, (rel, max_abs)

    print("KERNEL_OK")
</pallas_src>

<mosaic_0001>
module attributes {stable_mosaic.version = 11 : i64} {
  func.func @_bnrelu_conv3_kernel(%arg0: i32, %arg1: memref<1x4x256xf32, #tpu.memory_space<vmem>>, %arg2: memref<4x1xf32, #tpu.memory_space<vmem>>, %arg3: memref<4x1xf32, #tpu.memory_space<vmem>>, %arg4: memref<9x8x4xf32, #tpu.memory_space<vmem>>, %arg5: memref<8x1xf32, #tpu.memory_space<vmem>>, %arg6: memref<1x8x256xbf16, #tpu.memory_space<vmem>>, %arg7: memref<1x8x2xf32, #tpu.memory_space<vmem>>) attributes {dimension_semantics = [#tpu.dimension_semantics<parallel>], iteration_bounds = array<i64: 2>, scalar_prefetch = 0 : i64, scratch_operands = 0 : i64, tpu.core_type = #tpu.core_type<tc>, window_params = [{transform_indices = @transform_0, window_bounds = array<i64: 1, 4, 256>}, {pipeline_mode = #tpu.pipeline_mode<synchronous>, transform_indices = @transform_1, window_bounds = array<i64: 4, 1>}, {pipeline_mode = #tpu.pipeline_mode<synchronous>, transform_indices = @transform_2, window_bounds = array<i64: 4, 1>}, {pipeline_mode = #tpu.pipeline_mode<synchronous>, transform_indices = @transform_3, window_bounds = array<i64: 9, 8, 4>}, {pipeline_mode = #tpu.pipeline_mode<synchronous>, transform_indices = @transform_4, window_bounds = array<i64: 8, 1>}, {transform_indices = @transform_5, window_bounds = array<i64: 1, 8, 256>}, {transform_indices = @transform_6, window_bounds = array<i64: 1, 8, 2>}]} {
    %c0 = arith.constant 0 : index
    %c0_0 = arith.constant 0 : index
    %c0_1 = arith.constant 0 : index
    %0 = vector.load %arg1[%c0, %c0_0, %c0_1] : memref<1x4x256xf32, #tpu.memory_space<vmem>>, vector<1x4x256xf32>
    %1 = vector.shape_cast %0 : vector<1x4x256xf32> to vector<4x256xf32>
    %c0_2 = arith.constant 0 : index
    %c0_3 = arith.constant 0 : index
    %2 = vector.load %arg2[%c0_2, %c0_3] : memref<4x1xf32, #tpu.memory_space<vmem>>, vector<4x1xf32>
    %3 = vector.broadcast %2 : vector<4x1xf32> to vector<4x256xf32>
    %4 = arith.mulf %1, %3 : vector<4x256xf32>
    %c0_4 = arith.constant 0 : index
    %c0_5 = arith.constant 0 : index
    %5 = vector.load %arg3[%c0_4, %c0_5] : memref<4x1xf32, #tpu.memory_space<vmem>>, vector<4x1xf32>
    %6 = vector.broadcast %5 : vector<4x1xf32> to vector<4x256xf32>
    %7 = arith.addf %4, %6 : vector<4x256xf32>
    %cst = arith.constant 2.000000e-01 : f32
    %8 = vector.broadcast %cst : f32 to vector<4x256xf32>
    %9 = arith.mulf %8, %7 : vector<4x256xf32>
    %10 = arith.maximumf %7, %9 : vector<4x256xf32>
    %11 = tpu.iota {dimensions = array<i32: 1>} : vector<4x256xi32>
    %c15_i32 = arith.constant 15 : i32
    %12 = vector.broadcast %c15_i32 : i32 to vector<4x256xi32>
    %13 = arith.andi %11, %12 : vector<4x256xi32>
    %c1_i32 = arith.constant 1 : i32
    %14 = vector.broadcast %c1_i32 : i32 to vector<4x256xi32>
    %15 = arith.cmpi sge, %13, %14 : vector<4x256xi32>
    %c14_i32 = arith.constant 14 : i32
    %16 = vector.broadcast %c14_i32 : i32 to vector<4x256xi32>
    %17 = arith.cmpi sle, %13, %16 : vector<4x256xi32>
    %c16_i32 = arith.constant 16 : i32
    %18 = vector.broadcast %c16_i32 : i32 to vector<4x256xi32>
    %19 = arith.cmpi sge, %11, %18 : vector<4x256xi32>
    %c240_i32 = arith.constant 240 : i32
    %20 = vector.broadcast %c240_i32 : i32 to vector<4x256xi32>
    %21 = arith.cmpi slt, %11, %20 : vector<4x256xi32>
    %c17_i32 = arith.constant 17 : i32
    %22 = tpu.dynamic_rotate %10 by %c17_i32 dim 1 : vector<4x256xf32>, i32 -> vector<4x256xf32>
    %23 = arith.andi %19, %15 : vector<4x256xi1>
    %cst_6 = arith.constant 0.000000e+00 : f32
    %24 = vector.broadcast %cst_6 : f32 to vector<4x256xf32>
    %25 = arith.select %23, %22, %24 : vector<4x256xi1>, vector<4x256xf32>
    %c0_7 = arith.constant 0 : index
    %c0_8 = arith.constant 0 : index
    %c0_9 = arith.constant 0 : index
    %26 = vector.load %arg4[%c0_7, %c0_8, %c0_9] : memref<9x8x4xf32, #tpu.memory_space<vmem>>, vector<1x8x4xf32>
    %27 = vector.shape_cast %26 : vector<1x8x4xf32> to vector<8x4xf32>
    %cst_10 = arith.constant dense<0.000000e+00> : vector<8x256xf32>
    %28 = tpu.matmul %27, %25, %cst_10 {dimension_numbers = #tpu.dot_dimension_numbers<[1], [0], [0], [1], [0, 0, 1, 1], [], []>} : vector<8x4xf32>, vector<4x256xf32>, vector<8x256xf32> -> vector<8x256xf32>
    %c16_i32_11 = arith.constant 16 : i32
    %29 = tpu.dynamic_rotate %10 by %c16_i32_11 dim 1 : vector<4x256xf32>, i32 -> vector<4x256xf32>
    %cst_12 = arith.constant 0.000000e+00 : f32
    %30 = vector.broadcast %cst_12 : f32 to vector<4x256xf32>
    %31 = arith.select %19, %29, %30 : vector<4x256xi1>, vector<4x256xf32>
    %c1 = arith.constant 1 : index
    %c0_13 = arith.constant 0 : index
    %c0_14 = arith.constant 0 : index
    %32 = vector.load %arg4[%c1, %c0_13, %c0_14] : memref<9x8x4xf32, #tpu.memory_space<vmem>>, vector<1x8x4xf32>
    %33 = vector.shape_cast %32 : vector<1x8x4xf32> to vector<8x4xf32>
    %cst_15 = arith.constant dense<0.000000e+00> : vector<8x256xf32>
    %34 = tpu.matmul %33, %31, %cst_15 {dimension_numbers = #tpu.dot_dimension_numbers<[1], [0], [0], [1], [0, 0, 1, 1], [], []>} : vector<8x4xf32>, vector<4x256xf32>, vector<8x256xf32> -> vector<8x256xf32>
    %35 = arith.addf %28, %34 : vector<8x256xf32>
    %c15_i32_16 = arith.constant 15 : i32
    %36 = tpu.dynamic_rotate %10 by %c15_i32_16 dim 1 : vector<4x256xf32>, i32 -> vector<4x256xf32>
    %37 = arith.andi %19, %17 : vector<4x256xi1>
    %cst_17 = arith.constant 0.000000e+00 : f32
    %38 = vector.broadcast %cst_17 : f32 to vector<4x256xf32>
    %39 = arith.select %37, %36, %38 : vector<4x256xi1>, vector<4x256xf32>
    %c2 = arith.constant 2 : index
    %c0_18 = arith.constant 0 : index
    %c0_19 = arith.constant 0 : index
    %40 = vector.load %arg4[%c2, %c0_18, %c0_19] : memref<9x8x4xf32, #tpu.memory_space<vmem>>, vector<1x8x4xf32>
    %41 = vector.shape_cast %40 : vector<1x8x4xf32> to vector<8x4xf32>
    %cst_20 = arith.constant dense<0.000000e+00> : vector<8x256xf32>
    %42 = tpu.matmul %41, %39, %cst_20 {dimension_numbers = #tpu.dot_dimension_numbers<[1], [0], [0], [1], [0, 0, 1, 1], [], []>} : vector<8x4xf32>, vector<4x256xf32>, vector<8x256xf32> -> vector<8x256xf32>
    %43 = arith.addf %35, %42 : vector<8x256xf32>
    %c1_i32_21 = arith.constant 1 : i32
    %44 = tpu.dynamic_rotate %10 by %c1_i32_21 dim 1 : vector<4x256xf32>, i32 -> vector<4x256xf32>
    %cst_22 = arith.constant 0.000000e+00 : f32
    %45 = vector.broadcast %cst_22 : f32 to vector<4x256xf32>
    %46 = arith.select %15, %44, %45 : vector<4x256xi1>, vector<4x256xf32>
    %c3 = arith.constant 3 : index
    %c0_23 = arith.constant 0 : index
    %c0_24 = arith.constant 0 : index
    %47 = vector.load %arg4[%c3, %c0_23, %c0_24] : memref<9x8x4xf32, #tpu.memory_space<vmem>>, vector<1x8x4xf32>
    %48 = vector.shape_cast %47 : vector<1x8x4xf32> to vector<8x4xf32>
    %cst_25 = arith.constant dense<0.000000e+00> : vector<8x256xf32>
    %49 = tpu.matmul %48, %46, %cst_25 {dimension_numbers = #tpu.dot_dimension_numbers<[1], [0], [0], [1], [0, 0, 1, 1], [], []>} : vector<8x4xf32>, vector<4x256xf32>, vector<8x256xf32> -> vector<8x256xf32>
    %50 = arith.addf %43, %49 : vector<8x256xf32>
    %c4 = arith.constant 4 : index
    %c0_26 = arith.constant 0 : index
    %c0_27 = arith.constant 0 : index
    %51 = vector.load %arg4[%c4, %c0_26, %c0_27] : memref<9x8x4xf32, #tpu.memory_space<vmem>>, vector<1x8x4xf32>
    %52 = vector.shape_cast %51 : vector<1x8x4xf32> to vector<8x4xf32>
    %cst_28 = arith.constant dense<0.000000e+00> : vector<8x256xf32>
    %53 = tpu.matmul %52, %10, %cst_28 {dimension_numbers = #tpu.dot_dimension_numbers<[1], [0], [0], [1], [0, 0, 1, 1], [], []>} : vector<8x4xf32>, vector<4x256xf32>, vector<8x256xf32> -> vector<8x256xf32>
    %54 = arith.addf %50, %53 : vector<8x256xf32>
    %c255_i32 = arith.constant 255 : i32
    %55 = tpu.dynamic_rotate %10 by %c255_i32 dim 1 : vector<4x256xf32>, i32 -> vector<4x256xf32>
    %cst_29 = arith.constant 0.000000e+00 : f32
    %56 = vector.broadcast %cst_29 : f32 to vector<4x256xf32>
    %57 = arith.select %17, %55, %56 : vector<4x256xi1>, vector<4x256xf32>
    %c5 = arith.constant 5 : index
    %c0_30 = arith.constant 0 : index
    %c0_31 = arith.constant 0 : index
    %58 = vector.load %arg4[%c5, %c0_30, %c0_31] : memref<9x8x4xf32, #tpu.memory_space<vmem>>, vector<1x8x4xf32>
    %59 = vector.shape_cast %58 : vector<1x8x4xf32> to vector<8x4xf32>
    %cst_32 = arith.constant dense<0.000000e+00> : vector<8x256xf32>
    %60 = tpu.matmul %59, %57, %cst_32 {dimension_numbers = #tpu.dot_dimension_numbers<[1], [0], [0], [1], [0, 0, 1, 1], [], []>} : vector<8x4xf32>, vector<4x256xf32>, vector<8x256xf32> -> vector<8x256xf32>
    %61 = arith.addf %54, %60 : vector<8x256xf32>
    %c241_i32 = arith.constant 241 : i32
    %62 = tpu.dynamic_rotate %10 by %c241_i32 dim 1 : vector<4x256xf32>, i32 -> vector<4x256xf32>
    %63 = arith.andi %21, %15 : vector<4x256xi1>
    %cst_33 = arith.constant 0.000000e+00 : f32
    %64 = vector.broadcast %cst_33 : f32 to vector<4x256xf32>
    %65 = arith.select %63, %62, %64 : vector<4x256xi1>, vector<4x256xf32>
    %c6 = arith.constant 6 : index
    %c0_34 = arith.constant 0 : index
    %c0_35 = arith.constant 0 : index
    %66 = vector.load %arg4[%c6, %c0_34, %c0_35] : memref<9x8x4xf32, #tpu.memory_space<vmem>>, vector<1x8x4xf32>
    %67 = vector.shape_cast %66 : vector<1x8x4xf32> to vector<8x4xf32>
    %cst_36 = arith.constant dense<0.000000e+00> : vector<8x256xf32>
    %68 = tpu.matmul %67, %65, %cst_36 {dimension_numbers = #tpu.dot_dimension_numbers<[1], [0], [0], [1], [0, 0, 1, 1], [], []>} : vector<8x4xf32>, vector<4x256xf32>, vector<8x256xf32> -> vector<8x256xf32>
    %69 = arith.addf %61, %68 : vector<8x256xf32>
    %c240_i32_37 = arith.constant 240 : i32
    %70 = tpu.dynamic_rotate %10 by %c240_i32_37 dim 1 : vector<4x256xf32>, i32 -> vector<4x256xf32>
    %cst_38 = arith.constant 0.000000e+00 : f32
    %71 = vector.broadcast %cst_38 : f32 to vector<4x256xf32>
    %72 = arith.select %21, %70, %71 : vector<4x256xi1>, vector<4x256xf32>
    %c7 = arith.constant 7 : index
    %c0_39 = arith.constant 0 : index
    %c0_40 = arith.constant 0 : index
    %73 = vector.load %arg4[%c7, %c0_39, %c0_40] : memref<9x8x4xf32, #tpu.memory_space<vmem>>, vector<1x8x4xf32>
    %74 = vector.shape_cast %73 : vector<1x8x4xf32> to vector<8x4xf32>
    %cst_41 = arith.constant dense<0.000000e+00> : vector<8x256xf32>
    %75 = tpu.matmul %74, %72, %cst_41 {dimension_numbers = #tpu.dot_dimension_numbers<[1], [0], [0], [1], [0, 0, 1, 1], [], []>} : vector<8x4xf32>, vector<4x256xf32>, vector<8x256xf32> -> vector<8x256xf32>
    %76 = arith.addf %69, %75 : vector<8x256xf32>
    %c239_i32 = arith.constant 239 : i32
    %77 = tpu.dynamic_rotate %10 by %c239_i32 dim 1 : vector<4x256xf32>, i32 -> vector<4x256xf32>
    %78 = arith.andi %21, %17 : vector<4x256xi1>
    %cst_42 = arith.constant 0.000000e+00 : f32
    %79 = vector.broadcast %cst_42 : f32 to vector<4x256xf32>
    %80 = arith.select %78, %77, %79 : vector<4x256xi1>, vector<4x256xf32>
    %c8 = arith.constant 8 : index
    %c0_43 = arith.constant 0 : index
    %c0_44 = arith.constant 0 : index
    %81 = vector.load %arg4[%c8, %c0_43, %c0_44] : memref<9x8x4xf32, #tpu.memory_space<vmem>>, vector<1x8x4xf32>
    %82 = vector.shape_cast %81 : vector<1x8x4xf32> to vector<8x4xf32>
    %cst_45 = arith.constant dense<0.000000e+00> : vector<8x256xf32>
    %83 = tpu.matmul %82, %80, %cst_45 {dimension_numbers = #tpu.dot_dimension_numbers<[1], [0], [0], [1], [0, 0, 1, 1], [], []>} : vector<8x4xf32>, vector<4x256xf32>, vector<8x256xf32> -> vector<8x256xf32>
    %84 = arith.addf %76, %83 : vector<8x256xf32>
    %c0_46 = arith.constant 0 : index
    %c0_47 = arith.constant 0 : index
    %85 = vector.load %arg5[%c0_46, %c0_47] : memref<8x1xf32, #tpu.memory_space<vmem>>, vector<8x1xf32>
    %86 = vector.broadcast %85 : vector<8x1xf32> to vector<8x256xf32>
    %87 = arith.addf %84, %86 : vector<8x256xf32>
    %88 = arith.truncf %87 : vector<8x256xf32> to vector<8x256xbf16>
    %c0_48 = arith.constant 0 : index
    %c0_49 = arith.constant 0 : index
    %c0_50 = arith.constant 0 : index
    %89 = vector.load %arg6[%c0_48, %c0_49, %c0_50] : memref<1x8x256xbf16, #tpu.memory_space<vmem>>, vector<1x8x256xbf16>
    %90 = vector.shape_cast %89 : vector<1x8x256xbf16> to vector<8x256xbf16>
    %91 = vector.shape_cast %88 : vector<8x256xbf16> to vector<1x8x256xbf16>
    tpu.vector_store %arg6[%c0_48, %c0_49, %c0_50], %91 {strides = array<i32>} : memref<1x8x256xbf16, #tpu.memory_space<vmem>>, vector<1x8x256xbf16>,
    %92 = arith.extf %88 : vector<8x256xbf16> to vector<8x256xf32>
    %cst_51 = arith.constant dense<0.000000e+00> : vector<8xf32>
    %93 = vector.multi_reduction <add>, %92, %cst_51 [1] : vector<8x256xf32> to vector<8xf32>
    %94 = vector.shape_cast %93 : vector<8xf32> to vector<8x1xf32>
    %c0_52 = arith.constant 0 : index
    %c0_53 = arith.constant 0 : index
    %c0_54 = arith.constant 0 : index
    %95 = vector.load %arg7[%c0_52, %c0_53, %c0_54] : memref<1x8x2xf32, #tpu.memory_space<vmem>>, vector<1x8x1xf32>
    %96 = vector.shape_cast %95 : vector<1x8x1xf32> to vector<8x1xf32>
    %97 = vector.shape_cast %94 : vector<8x1xf32> to vector<1x8x1xf32>
    tpu.vector_store %arg7[%c0_52, %c0_53, %c0_54], %97 {strides = array<i32>} : memref<1x8x2xf32, #tpu.memory_space<vmem>>, vector<1x8x1xf32>,
    %98 = arith.mulf %92, %92 : vector<8x256xf32>
    %cst_55 = arith.constant dense<0.000000e+00> : vector<8xf32>
    %99 = vector.multi_reduction <add>, %98, %cst_55 [1] : vector<8x256xf32> to vector<8xf32>
    %100 = vector.shape_cast %99 : vector<8xf32> to vector<8x1xf32>
    %c0_56 = arith.constant 0 : index
    %c0_57 = arith.constant 0 : index
    %c1_58 = arith.constant 1 : index
    %101 = vector.load %arg7[%c0_56, %c0_57, %c1_58] : memref<1x8x2xf32, #tpu.memory_space<vmem>>, vector<1x8x1xf32>
    %102 = vector.shape_cast %101 : vector<1x8x1xf32> to vector<8x1xf32>
    %103 = vector.shape_cast %100 : vector<8x1xf32> to vector<1x8x1xf32>
    tpu.vector_store %arg7[%c0_56, %c0_57, %c1_58], %103 {strides = array<i32>} : memref<1x8x2xf32, #tpu.memory_space<vmem>>, vector<1x8x1xf32>,
    return
  }
  func.func @transform_0(%arg0: i32) -> (i32, i32, i32) {
    %c0_i32 = arith.constant 0 : i32
    %c0_i32_0 = arith.constant 0 : i32
    %c0_i32_1 = arith.constant 0 : i32
    return %arg0, %c0_i32, %c0_i32_0 : i32, i32, i32
  }
  func.func @transform_1(%arg0: i32) -> (i32, i32) {
    %c0_i32 = arith.constant 0 : i32
    %c0_i32_0 = arith.constant 0 : i32
    %c0_i32_1 = arith.constant 0 : i32
    return %c0_i32, %c0_i32_0 : i32, i32
  }
  func.func @transform_2(%arg0: i32) -> (i32, i32) {
    %c0_i32 = arith.constant 0 : i32
    %c0_i32_0 = arith.constant 0 : i32
    %c0_i32_1 = arith.constant 0 : i32
    return %c0_i32, %c0_i32_0 : i32, i32
  }
  func.func @transform_3(%arg0: i32) -> (i32, i32, i32) {
    %c0_i32 = arith.constant 0 : i32
    %c0_i32_0 = arith.constant 0 : i32
    %c0_i32_1 = arith.constant 0 : i32
    %c0_i32_2 = arith.constant 0 : i32
    return %c0_i32, %c0_i32_0, %c0_i32_1 : i32, i32, i32
  }
  func.func @transform_4(%arg0: i32) -> (i32, i32) {
    %c0_i32 = arith.constant 0 : i32
    %c0_i32_0 = arith.constant 0 : i32
    %c0_i32_1 = arith.constant 0 : i32
    return %c0_i32, %c0_i32_0 : i32, i32
  }
  func.func @transform_5(%arg0: i32) -> (i32, i32, i32) {
    %c0_i32 = arith.constant 0 : i32
    %c0_i32_0 = arith.constant 0 : i32
    %c0_i32_1 = arith.constant 0 : i32
    return %arg0, %c0_i32, %c0_i32_0 : i32, i32, i32
  }
  func.func @transform_6(%arg0: i32) -> (i32, i32, i32) {
    %c0_i32 = arith.constant 0 : i32
    %c0_i32_0 = arith.constant 0 : i32
    %c0_i32_1 = arith.constant 0 : i32
    return %arg0, %c0_i32, %c0_i32_0 : i32, i32, i32
  }
}

</mosaic_0001>

<bundles_post_ra>
// kernel: tpu_custom_call.1
= control target key start
LH: loop header
LB: loop body
LE: loop exit
PB: predicated region body
PF: predicated region fallthrough
CT: control target
= control target key end

     0   :  { %12 = vsyncpa [#allocation3], 0  ;;  %s1750_s0 = inlined_call_operand.vmem [shape: f32[2,4,256], index: 0, kind: input, shape index: {}]   ;;  %s1751_s1 = inlined_call_operand.vmem [shape: f32[4,1], index: 1, kind: input, shape index: {}]   ;;  %s1752_s2 = inlined_call_operand.vmem [shape: f32[4,1], index: 2, kind: input, shape index: {}]   ;;  %s1753_s3 = inlined_call_operand.vmem [shape: f32[9,8,4], index: 3, kind: input, shape index: {}]   ;;  %s1754_s4 = inlined_call_operand.vmem [shape: f32[8,1], index: 4, kind: input, shape index: {}]   ;;  %s1755_s5 = inlined_call_operand.hbm [shape: bf16[2,8,256], index: 5, kind: output, shape index: {0}]   ;;  %s1756_s6 = inlined_call_operand.vmem [shape: f32[2,8,2], index: 6, kind: output, shape index: {1}]  }
   0x1   :  { %14 = vsyncpa [#allocation3 + $0x1], 0  ;;  %s1505_s21 = smov 0   ;;  %s1507_s22 = smov 0  }
   0x2   :  { %s1509_s23 = smov 0   ;;  %s1511_s24 = smov 0  }
   0x3 LB: > { %s1526_s25 = sadd.s32 4294967295, %s1456_s24   ;;  %s1275_s26 = sadd.s32 4294967294, %s1456_s24   ;;  %s1456_s24 = sphi %s1511_s24, %s1770_s24   ;;  %s1452_s23 = sphi %s1509_s23, %s1769_s23   ;;  %s1448_s22 = sphi %s1507_s22, %s1768_s22   ;;  %s1444_s21 = sphi %s1505_s21, %s1767_s21  }
   0x4   : > { %s1530_s27 = sadd.s32 1, %s1456_s24   ;;  %s137_s28 = sadd.s32 1, %s1452_s23 }
   0x5   : > { %s134_s29 = ssub.s32 %s1456_s24, %s1530_s27  ;;  %p147_p0 = scmp.ne.s32.totalorder %s1452_s23, %s1448_s22 }
   0x6   : > { %p135_p1 = scmp.eq.s32.totalorder %s134_s29, 0  ;;  %p148_p2 = scmp.eq.s32.totalorder %s1526_s25, 1 }
   0x7   : > { %p153_p3 = scmp.ne.s32.totalorder %s1448_s22, %s1444_s21  ;;  %p154_p4 = scmp.eq.s32.totalorder %s1275_s26, 1 }
   0x8   : > { %s1541_s30 = scalar_select %p135_p1, %s1452_s23, %s137_s28  }
   0x9   : > { %p1543_p5 = por %p148_p2, %p147_p0  ;;  %p1547_p6 = por %p154_p4, %p153_p3 }
   0xa   : > { %p1278_p7 = scmp.ge.s32.totalorder %s1456_s24, 1  ;;  %p218_p8 = scmp.lt.s32.totalorder %s1456_s24, 3 }
   0xc   : > { %p219_p9 = pnand %p1278_p7, %p218_p8 }
   0xd   : > { %v262_v0 = vld [vmem:[%s1751_s1] sm:$0xf] (!%p219_p9)  ;;  %v1458_v1 = vmov (!%p219_p9), 0   ;;  %p252_p10 = scmp.lt.s32.totalorder (!%p219_p9), %s1526_s25, 1  ;;  %v1459_v3 = vmov (!%p219_p9), 839922192   ;;  %v270_v5 = vlaneseq (!%p219_p9) }
   0xe   : > { %222 = sbr.rel (%p219_p9) target bundleno = 674 (0x2a2), region = 40  ;;  %1393 = vset.pattern.permute.xlu0 (!%p219_p9), %v1458_v1  ;;  %v276_v2 = vld [vmem:[%s1752_s2] sm:$0xf] (!%p219_p9)  ;;  %v268_v4 = vunpack.c.l.s4 (!%p219_p9), %v1459_v3  ;;  %v1460_v10 = vmov (!%p219_p9), 0.0   ;;  %vm335_vm0 = vcmask (!%p219_p9), 1043456   ;;  %s1461_s18 = smov (!%p219_p9), 16  }
   0xf   : > { %265 = vperm.xlu0 (!%p219_p9), %1393, %v262_v0   ;;  %v271_v7 = vshrl.u32 (!%p219_p9), %v270_v5, 7  ;;  %754 = vmatprep.mubr.f32.mxu0 (!%p219_p9), %v1460_v10  ;;  %s1462_s19 = smov (!%p219_p9), 127   ;;  %vm331_vm1 = vcmask (!%p219_p9), 31744   ;;  %v1298_v20 = vld [vmem:[%s1753_s3 + $0x20] sm:$0xff] (!%p219_p9)  ;;  %s1463_s28 = smov (!%p219_p9), 17   ;;  %v1581_v22 = vand.u32 (!%p219_p9), 127, %v270_v5 }
  0x10   : > { %v269_v6 = vunpack.c.0.s8 (!%p219_p9), %v268_v4  ;;  %406 = vmatprep.mubr.f32.mxu1 (!%p219_p9), %v1460_v10  ;;  %s1464_s29 = smov (!%p219_p9), 113   ;;  %s1465_s9 = smov (!%p219_p9), 15   ;;  %v1139_v21 = vld [vmem:[%s1754_s4] sm:$0xff] (!%p219_p9)  ;;  %v1302_v36 = vld [vmem:[%s1753_s3 + $0x28] sm:$0xff] (!%p219_p9)  ;;  %v1306_v57 = vld [vmem:[%s1753_s3 + $0x30] sm:$0xff] (!%p219_p9) }
  0x11   : > { %s1466_s10 = smov (!%p219_p9), 112   ;;  %s1467_s11 = smov (!%p219_p9), 1   ;;  %v1584_v23 = vadd.s32 (!%p219_p9), 128, %v1581_v22  ;;  %v295_v24 = vand.u32 (!%p219_p9), 15, %v1581_v22  ;;  %vm767_vm2 = vcmp.lt.s32.totalorder (!%p219_p9), %v1581_v22, 127  ;;  %vm324_vm5 = vcmp.lt.s32.totalorder (!%p219_p9), %v1581_v22, 16 }
  0x12   : > { %v272_v8 = vsub.s32 (!%p219_p9), %v269_v6, %v271_v7  ;;  %s1468_s12 = smov (!%p219_p9), 111   ;;  %vm301_vm6 = vcmp.ge.s32.totalorder (!%p219_p9), %v1581_v22, 16  ;;  %v1283_v42 = vld [vmem:[%s1753_s3 + $0x8] sm:$0xff] (!%p219_p9)  ;;  %vm312_vm8 = vcmp.lt.s32.totalorder (!%p219_p9), %v1581_v22, 17  ;;  %vm860_vm12 = vcmp.lt.s32.totalorder (!%p219_p9), %v1581_v22, 113  ;;  %v319_v54 = vld [vmem:[%s1753_s3] sm:$0xff] (!%p219_p9) }
  0x13   : > { %279 = vperm.xlu0 (!%p219_p9), %1393, %v276_v2   ;;  %v296_v25 = vand.u32 (!%p219_p9), 15, %v1584_v23  ;;  %vm1589_vm3 = vcmp.le.s32.totalorder (!%p219_p9), %v295_v24, 14  ;;  %vm1608_vm7 = vcmp.ge.s32.totalorder (!%p219_p9), %v295_v24, 1  ;;  %vm304_vm11 = vcmp.lt.s32.totalorder (!%p219_p9), %v1584_v23, 240  ;;  %v1290_v2 = vld [vmem:[%s1753_s3 + $0x10] sm:$0xff] (!%p219_p9)  ;;  %v1310_v5 = vld [vmem:[%s1753_s3 + $0x38] sm:$0xff] (!%p219_p9) }
  0x14   : > { %vm315_vm10 = vmand (!%p219_p9), %vm301_vm6, %vm1608_vm7  ;;  %vm497_vm14 = vcmp.lt.s32.totalorder (!%p219_p9), %v1581_v22, 15  ;;  %s243_s20 = sand.u32 (!%p219_p9), 1, %s1448_s22  }
  0x15   : > { %s1561_s13 = scalar_select %p252_p10, %s1526_s25, 1  ;;  %vm1593_vm4 = vcmp.le.s32.totalorder %v296_v25, 14  ;;  %vm1622_vm9 = vcmp.ge.s32.totalorder %v296_v25, 1  ;;  %vm500_vm15 = vmand %vm301_vm6, %vm1589_vm3 }
  0x16   : > { %vm864_vm13 = vmand %vm304_vm11, %vm1622_vm9  ;;  %s1279_s26 = sshll.u32 %s243_s20, 3  ;;  %s1171_s15 = scalar_lea.sflag [#allocation3], %s243_s20 }
  0x17   : > { %s1324_s14 = sshll.u32 %s1561_s13, 3 }
  0x18   : > { %s256_s17 = scalar_lea.vmem %s1750_s0, %s1324_s14 }
  0x19   : > { %v261_v12 = vld [vmem:[%s256_s17] sm:$0xff]  ;;  %s1469_s17 = smov [#allocation2]  }
  0x8e   : > { %v266_v9 = vpop.permute.xlu0 %265 }
  0x8f   : > { %v273_v11 = vrot.slane %v266_v9, %v272_v8 }
  0x91   : > { %v275_v14 = vmul.f32 %v273_v11, %v261_v12 }
  0x92   : > { %v280_v13 = vpop.permute.xlu0 %279 }
  0x93   : > { %v287_v15 = vrot.slane %v280_v13, %v272_v8 }
  0x95   : > { %v289_v16 = vadd.f32 %v287_v15, %v275_v14 }
  0x97   : > { %v290_v17 = vmul.f32 0.2, %v289_v16 }
  0x99   : > { %v291_v18 = vmax.f32 %v289_v16, %v290_v17  ;;  %v1294_v17 = vld [vmem:[%s1753_s3 + $0x18] sm:$0xff] }
  0x9b   : > { %320 = vrot.lane.b32.xlu0 %v291_v18, %s1461_s18  ;;  %763 = vrot.lane.b32.xlu1 %v291_v18, %s1462_s19  ;;  %v306_v19 = vcombine.high %v291_v18, %v291_v18 }
  0x9d   : > { %1299 = vmatprep.subr.msk.mxu0 %vm335_vm0, %v306_v19 }
  0x9e   : > { %1300 = vmatpush1.msk.msra.mxu0 %vm335_vm0, %v291_v18 }
  0x9f   : > { %308 = vrot.lane.b32.xlu0 %v291_v18, %s1463_s28  ;;  %765 = vrot.lane.b32.xlu1 %v306_v19, %s1462_s19 }
  0xa0   : > { %1301 = vmatmul.mubr.msk.f32.vlgmr.msra.gmra.mrb[0].mxu0 %vm331_vm1, %v1298_v20 }
  0xa1   : > { %847 = vmatprep.mubr.f32.mxu0 %v1460_v10 }
  0xa3   : > { %856 = vrot.lane.b32.xlu0 %v291_v18, %s1464_s29  ;;  %322 = vrot.lane.b32.xlu1 %v306_v19, %s1461_s18  ;;  %s1398_s18 = sshll.u32 %s1469_s17, 4  ;;  %s1399_s18 = int_to_ptr.vmem [resolvable:$false] %s1398_s18 }
  0xa4   : > { %s1400_s19 = scalar_lea.vmem %s1399_s18, 256 }
  0xa7   : > { %493 = vrot.lane.b32.xlu0 %v291_v18, %s1465_s9  ;;  %310 = vrot.lane.b32.xlu1 %v306_v19, %s1463_s28  ;;  %s245_s28 = scalar_lea.vmem [#allocation2], %s1279_s26 }
  0xab   : > { %951 = vrot.lane.b32.xlu0 %v291_v18, %s1466_s10  ;;  %858 = vrot.lane.b32.xlu1 %v306_v19, %s1464_s29  ;;  %s1326_s29 = sshll.u32 %s1526_s25, 7 }
  0xaf   : > { %588 = vrot.lane.b32.xlu0 %v291_v18, %s1467_s11  ;;  %495 = vrot.lane.b32.xlu1 %v306_v19, %s1465_s9  ;;  %s1189_s9 = sshll.u32 %s245_s28, 4  ;;  %s1190_s9 = int_to_ptr.vmem [resolvable:$true] %s1189_s9 }
  0xb0   : > { %s1394_s16 = scalar_lea.vmem %s1190_s9, 128  ;;  %p1401_p0 = scmp.lt.s32.totalorder %s1190_s9, %s1399_s18 }
  0xb1   : > { %p1395_p11 = scmp.ne.s32.totalorder %s1190_s9, %s1394_s16  ;;  %p1402_p1 = scmp.lt.s32.totalorder %s1400_s19, %s1394_s16 }
  0xb3   : > { %1044 = vrot.lane.b32.xlu0 %v291_v18, %s1468_s12  ;;  %953 = vrot.lane.b32.xlu1 %v306_v19, %s1466_s10  ;;  %p1396_p12 = pnand %p1395_p11, %p1543_p5  ;;  %p1403_p2 = por %p1402_p1, %p1401_p0 }
  0xb5   : > { %p1397_p13 = pneg %p1396_p12 }
  0xb7   : > { %1142 = vperm.xlu0 %1393, %v1139_v21   ;;  %590 = vrot.lane.b32.xlu1 %v306_v19, %s1467_s11  ;;  %p1404_p3 = pnand %p1403_p2, %p1397_p13 }
  0xbb   : > { %1046 = vrot.lane.b32.xlu1 %v306_v19, %s1468_s12  ;;  %v1314_v19 = vld [vmem:[%s1753_s3 + $0x40] sm:$0xff]  ;;  %s1709_s12 = scalar_lea.hbm %s1755_s5, %s1326_s29 }
 0x10d   : > { %v321_v26 = vpop.permute.xlu0 %320  ;;  %v764_v27 = vpop.permute.xlu1 %763 }
 0x111   : > { %v309_v30 = vpop.permute.xlu0 %308  ;;  %v766_v31 = vpop.permute.xlu1 %765 }
 0x112   : > { %v768_v32 = vsel %vm767_vm2, %v764_v27, %v766_v31  ;;  %v769_v33 = vsel %vm767_vm2, %v766_v31, %v764_v27  ;;  %vm955_vm2 = vcmp.lt.s32.totalorder %v1581_v22, 112 }
 0x113   : > { %v770_v34 = vsel %vm1589_vm3, %v768_v32, 0.0  ;;  %v771_v35 = vsel %vm1593_vm4, %v769_v33, 0.0 }
 0x114   : > { %1303 = vmatprep.subr.msk.mxu0 %vm335_vm0, %v771_v35 }
 0x115   : > { %v857_v37 = vpop.permute.xlu0 %856  ;;  %v323_v38 = vpop.permute.xlu1 %322  ;;  %1304 = vmatpush1.msk.msra.mxu0 %vm335_vm0, %v770_v34 }
 0x116   : > { %v326_v40 = vsel %vm324_vm5, %v323_v38, %v321_v26  ;;  %v325_v41 = vsel %vm324_vm5, %v321_v26, %v323_v38  ;;  %1305 = vmatmul.mubr.msk.f32.vlgmr.msra.gmra.mrb[0].mxu0 %vm331_vm1, %v1302_v36  ;;  %vm592_vm5 = vcmp.lt.s32.totalorder %v1581_v22, 1 }
 0x117   : > { %1284 = vmatprep.subr.msk.mxu1 %vm335_vm0, %v325_v41  ;;  %v327_v43 = vsel %vm301_vm6, %v326_v40, 0.0  ;;  %942 = vmatprep.mubr.f32.mxu0 %v1460_v10  ;;  %vm1048_vm6 = vcmp.lt.s32.totalorder %v1581_v22, 111 }
 0x118   : > { %1285 = vmatpush1.msk.msra.mxu1 %vm335_vm0, %v327_v43 }
 0x119   : > { %1286 = vmatmul.mubr.msk.f32.vlgmr.msra.gmra.mrb[0].mxu1 %vm331_vm1, %v1283_v42  ;;  %v311_v45 = vpop.permute.xlu1 %310  ;;  %v494_v48 = vpop.permute.xlu0 %493 }
 0x11a   : > { %v313_v46 = vsel %vm312_vm8, %v309_v30, %v311_v45  ;;  %v314_v47 = vsel %vm312_vm8, %v311_v45, %v309_v30  ;;  %486 = vmatprep.mubr.f32.mxu1 %v1460_v10  ;;  %vm1052_vm8 = vmand %vm304_vm11, %vm1593_vm4 }
 0x11b   : > { %v317_v49 = vsel %vm315_vm10, %v314_v47, 0.0  ;;  %v318_v50 = vsel %vm1622_vm9, %v313_v46, 0.0 }
 0x11c   : > { %1287 = vmatprep.subr.msk.mxu1 %vm335_vm0, %v318_v50 }
 0x11d   : > { %1288 = vmatpush1.msk.msra.mxu1 %vm335_vm0, %v317_v49  ;;  %v859_v51 = vpop.permute.xlu1 %858  ;;  %v952_v58 = vpop.permute.xlu0 %951 }
 0x11e   : > { %v861_v52 = vsel %vm860_vm12, %v857_v37, %v859_v51  ;;  %v862_v53 = vsel %vm860_vm12, %v859_v51, %v857_v37 }
 0x11f   : > { %v865_v55 = vsel %vm1608_vm7, %v861_v52, 0.0  ;;  %v866_v56 = vsel %vm864_vm13, %v862_v53, 0.0 }
 0x120   : > { %1307 = vmatprep.subr.msk.mxu0 %vm335_vm0, %v866_v56 }
 0x121   : > { %1289 = vmatmul.mubr.msk.f32.vlgmr.msra.gmra.mrb[0].mxu1 %vm331_vm1, %v319_v54  ;;  %v496_v59 = vpop.permute.xlu1 %495  ;;  %1308 = vmatpush1.msk.msra.mxu0 %vm335_vm0, %v865_v55  ;;  %v589_v3 = vpop.permute.xlu0 %588 }
 0x122   : > { %v498_v60 = vsel %vm497_vm14, %v494_v48, %v496_v59  ;;  %v499_v61 = vsel %vm497_vm14, %v496_v59, %v494_v48  ;;  %1309 = vmatmul.mubr.msk.f32.vlgmr.msra.gmra.mrb[0].mxu0 %vm331_vm1, %v1306_v57  ;;  %579 = vmatprep.mubr.f32.mxu1 %v1460_v10 }
 0x123   : > { %v502_v62 = vsel %vm500_vm15, %v499_v61, 0.0  ;;  %v503_v63 = vsel %vm1593_vm4, %v498_v60, 0.0  ;;  %1035 = vmatprep.mubr.f32.mxu0 %v1460_v10 }
 0x124   : > { %1291 = vmatprep.subr.msk.mxu1 %vm335_vm0, %v503_v63 }
 0x125   : > { %1292 = vmatpush1.msk.msra.mxu1 %vm335_vm0, %v502_v62  ;;  %v954_v0 = vpop.permute.xlu1 %953  ;;  %v1045_v13 = vpop.permute.xlu0 %1044 }
 0x126   : > { %v957_v1 = vsel %vm955_vm2, %v954_v0, %v952_v58  ;;  %v956_v6 = vsel %vm955_vm2, %v952_v58, %v954_v0 }
 0x127   : > { %v959_v4 = vsel %vm304_vm11, %v957_v1, 0.0 }
 0x128   : > { %1311 = vmatprep.subr.msk.mxu0 %vm335_vm0, %v959_v4 }
 0x129   : > { %1293 = vmatmul.mubr.msk.f32.vlgmr.msra.gmra.mrb[0].mxu1 %vm331_vm1, %v1290_v2  ;;  %v591_v7 = vpop.permute.xlu1 %590  ;;  %1312 = vmatpush1.msk.msra.mxu0 %vm335_vm0, %v956_v6 }
 0x12a   : > { %v593_v8 = vsel %vm592_vm5, %v589_v3, %v591_v7  ;;  %v594_v9 = vsel %vm592_vm5, %v591_v7, %v589_v3  ;;  %1313 = vmatmul.mubr.msk.f32.vlgmr.msra.gmra.mrb[0].mxu0 %vm331_vm1, %v1310_v5  ;;  %672 = vmatprep.mubr.f32.mxu1 %v1460_v10 }
 0x12b   : > { %v595_v11 = vsel %vm1608_vm7, %v594_v9, 0.0  ;;  %v596_v12 = vsel %vm1622_vm9, %v593_v8, 0.0  ;;  %1130 = vmatprep.mubr.f32.mxu0 %v1460_v10 }
 0x12c   : > { %1295 = vmatprep.subr.msk.mxu1 %vm335_vm0, %v596_v12 }
 0x12d   : > { %1296 = vmatpush1.msk.msra.mxu1 %vm335_vm0, %v595_v11  ;;  %v1047_v14 = vpop.permute.xlu1 %1046 }
 0x12e   : > { %v1049_v15 = vsel %vm1048_vm6, %v1045_v13, %v1047_v14  ;;  %v1050_v16 = vsel %vm1048_vm6, %v1047_v14, %v1045_v13 }
 0x12f   : > { %v1053_v10 = vsel %vm1589_vm3, %v1049_v15, 0.0  ;;  %v1054_v18 = vsel %vm1052_vm8, %v1050_v16, 0.0 }
 0x130   : > { %1315 = vmatprep.subr.msk.mxu0 %vm335_vm0, %v1054_v18 }
 0x131   : > { %1297 = vmatmul.mubr.msk.f32.vlgmr.msra.gmra.mrb[0].mxu1 %vm331_vm1, %v1294_v17  ;;  %1316 = vmatpush1.msk.msra.mxu0 %vm335_vm0, %v1053_v10 }
 0x132   : > { %1317 = vmatmul.mubr.msk.f32.vlgmr.msra.gmra.mrb[0].mxu0 %vm331_vm1, %v1314_v19 }
 0x136   : > { %v1143_v25 = vpop.permute.xlu0 %1142 }
 0x204   : > { %v674_v20 = vpop.f32.mrb[0].mxu1 }
 0x205   : > { %v676_v21 = vpop.f32.mrb[1].mxu1  ;;  %v1132_v22 = vpop.f32.mrb[0].mxu0 }
 0x206   : > { %v1327_v23 = vadd.f32 %v1132_v22, %v674_v20  ;;  %v1134_v24 = vpop.f32.mrb[1].mxu0 }
 0x207   : > { %v1328_v26 = vadd.f32 %v1134_v24, %v676_v21 }
 0x208   : > { %v1145_v27 = vadd.f32 %v1327_v23, %v1143_v25 }
 0x209   : > { %v1146_v28 = vadd.f32 %v1328_v26, %v1143_v25 }
 0x20a   : > { %v1147_v29 = vpack.c.bf16 %v1145_v27, %v1145_v27 }
 0x20b   : > { %v1325_v30 = vpack.c.bf16 %v1146_v28, %v1145_v27  ;;  %v1148_v31 = vpack.c.bf16 %v1146_v28, %v1146_v28 }
 0x20c   : > { %v1156_v32 = vunpack.c.l.bf16 %v1147_v29 }
 0x20d   : > { %v1157_v33 = vunpack.c.l.bf16 %v1148_v31  ;;  %1155 = vst [vmem:[%s245_s28] sm:$0xff] %v1325_v30 }
 0x20e   : > { %v1163_v34 = vmul.f32 %v1156_v32, %v1156_v32 }
 0x20f   : > { %v1158_v35 = vadd.f32 %v1157_v33, %v1156_v32  ;;  %v1164_v36 = vmul.f32 %v1157_v33, %v1157_v33 }
 0x211   : > { %1159 = vadd.xlane.f32.xlu1 %v1158_v35  ;;  %v1165_v37 = vadd.f32 %v1164_v36, %v1163_v34 }
 0x213   : > { %1166 = vadd.xlane.f32.xlu0 %v1165_v37 }
 0x214   : > { %1407 = shalt.err (!%p1404_p3)
}
 0x215   : > { %s1408_s25 = scalar_lea.hbm %s1709_s12, 128  ;;  %s1412_s28 = scalar_lea.hbm %s1755_s5, 256 }
 0x216   : > { %p1409_p4 = scmp.ne.s32.totalorder %s1709_s12, %s1408_s25  ;;  %p1413_p9 = scmp.lt.u32.totalorder %s1709_s12, %s1755_s5 }
 0x217   : > { %p1414_p10 = scmp.lt.u32.totalorder %s1412_s28, %s1408_s25  ;;  %p1416_p12 = scmp.lt.u32.totalorder %s1408_s25, %s1709_s12 }
 0x218   : > { %p1410_p7 = pnand %p1409_p4, %p1543_p5 }
 0x219   : > { %p1415_p11 = por %p1414_p10, %p1413_p9 }
 0x21a   : > { %p1411_p8 = pneg %p1410_p7 }
 0x21b   : > { %p1417_p13 = por %p1416_p12, %p1415_p11 }
 0x21d   : > { %p1418_p0 = pnand %p1417_p13, %p1411_p8 }
 0x21f   : > { %1421 = shalt.err (!%p1418_p0)
}
 0x220   : > { %1343 = dma.vmem_to_hbm [thread:$0]  (%p1543_p5), %s1190_s9, 128, %s1709_s12, %s1171_s15   ;;  %vm1161_vm0 = vcmask 7168   ;;  %vm1168_vm1 = vcmask 15368  }
 0x221   : > { %s260_s17 = scalar_lea.vmem %s1756_s6, %s1324_s14 }
 0x29e   : > { %v1160_v38 = vpop.xlane.xlu1 %1159 }
 0x29f   : > { %1162 = vst.msk [vmem:[%s260_s17] sm:$0xff] %vm1161_vm0, %v1160_v38 }
 0x2a0   : > { %v1167_v39 = vpop.xlane.xlu0 %1166 }
 0x2a1   : > { %1169 = vst.msk [vmem:[%s260_s17] sm:$0xff] %vm1168_vm1, %v1167_v39 }
 0x2a2 PF: > { %p1349_p1 = scmp.ge.s32.totalorder %s1456_s24, 2  ;;  %s1204_s7 = sand.u32 1, %s1444_s21  }
 0x2a3   : > { %s1205_s9 = scalar_lea.sflag [#allocation3], %s1204_s7 }
 0x2a4   : > { %p1346_p2 = pnand %p1349_p1, %p1547_p6 }
 0x2a6   : > { %1439 = dma.done.wait (!%p1346_p2), %s1205_s9, 128  }
 0x2a7   : > { %1441 = vsyncadd (!%p1346_p2), %s1205_s9, 4294967168  ;;  %p17_p5 = scmp.ge.s32.totalorder %s1530_s27, 4   ;;  %s1767_s21 = smov %s1448_s22 }
 0x2a8   : > { %s1768_s22 = smov %s1452_s23  ;;  %s1769_s23 = smov %s1541_s30 }
 0x2a9   : > { %s1770_s24 = smov %s1530_s27  ;;  %19 = sbr.rel (!%p17_p5) target bundleno = 3 (0x3), region = 95 }
 0x2b0   :  { %1217 = vsyncpa [#allocation3], 1 }
 0x2b1   :  { %1219 = vsyncpa [#allocation3 + $0x1], 1 }

</bundles_post_ra>
